<compile_context>
chip_gen: v6e
topology: v6e:2x2x1
jax: 0.10.0
libtpu: 0.0.40
codegen_flags: <defaults>
</compile_context>

<pallas_src>
import functools

import jax
import jax.numpy as jnp
import numpy as np
from jax.experimental import pallas as pl
from jax.experimental.pallas import tpu as pltpu


def _spatial_block_kernel(x_ref, m_ref, w1_ref, b1_ref, w2_ref, b2_ref, o_ref):
    """One (bt, D, L) batch-tile per grid step.

    x_ref : (bt, D, L)   input tile (original layout, no relayout)
    m_ref : (L, L) f32   banded pooling matrix, entries 1/k inside |i-j|<=pad
    w1_ref: (P8, D) f32  fc1 weight  (rows >= d_prime are zero padding)
    b1_ref: (P8, 1) f32  fc1 bias    (padded rows are zero)
    w2_ref: (D, P8) f32  fc2 weight  (cols >= d_prime are zero padding)
    b2_ref: (D, 1)  f32  fc2 bias
    o_ref : (bt, D, L)   output tile
    """
    x = x_ref[...]
    xf = x.astype(jnp.float32)
    bt, dim, length = xf.shape
    p8 = w1_ref.shape[0]

    # fc1 commuted ahead of the (linear) pooling:
    #   t[b, p, l] = sum_d W1[p, d] * x[b, d, l]
    w1b = jnp.broadcast_to(w1_ref[...], (bt, p8, dim))
    t = jax.lax.dot_general(
        w1b, xf, (((2,), (1,)), ((0,), (0,))),
        preferred_element_type=jnp.float32)                       # (bt, P8, L)

    # AvgPool1d(k, stride=1, pad, count_include_pad=True) along L as one MXU
    # matmul against the banded (L, L) matrix.  P8 is a multiple of 8, so the
    # leading-dim merge below is a layout-trivial reshape.
    t2 = t.reshape(bt * p8, length)
    pooled = jnp.dot(t2, m_ref[...], preferred_element_type=jnp.float32)
    pooled = pooled.reshape(bt, p8, length)                       # (bt, P8, L)

    # fc1 bias + ReLU  (bias is added after pooling; pooling is linear so this
    # is identical to PyTorch's fc1(pool(x)) ordering).
    h = jnp.maximum(pooled + b1_ref[...], 0.0)                    # (bt, P8, L)

    # fc2 + sigmoid: g[b, d, l] = sigmoid(sum_p W2[d, p] * h[b, p, l] + b2[d]).
    w2b = jnp.broadcast_to(w2_ref[...], (bt, dim, p8))
    g = jax.lax.dot_general(
        w2b, h, (((2,), (1,)), ((0,), (0,))),
        preferred_element_type=jnp.float32)                       # (bt, D, L)
    g = jax.nn.sigmoid(g + b2_ref[...])

    o_ref[...] = (xf * g).astype(o_ref.dtype)


def _choose_block_batch(B, D, L, itemsize, *, target_tile_bytes, max_block_batch=64):
    """Whole batch elements per grid step.

    Picks the largest divisor of B such that the (bt, D, L) tile is roughly
    `target_tile_bytes`, the batched-matmul unroll stays bounded, and there are
    at least two grid steps whenever B >= 2 (megacore balance).  Using a
    divisor of B avoids any batch padding (and the extra HBM copy it costs).
    """
    per_b = max(D * L * itemsize, 1)
    cap = max(1, target_tile_bytes // per_b)
    cap = min(cap, max_block_batch)          # bound the batched-dot unroll
    if B >= 2:
        cap = min(cap, (B + 1) // 2)         # >= 2 grid steps for megacore
    cap = max(1, min(cap, B))
    bt = 1
    for cand in range(1, int(cap) + 1):
        if B % cand == 0:
            bt = cand
    return bt


@functools.partial(jax.jit, static_argnames=("pool_kernel_size", "target_tile_bytes"))
def spatial_block(x, w1, b1, w2, b2, *, pool_kernel_size, target_tile_bytes=2 << 20):
    """Pallas forward of Spatial_Block.  x: (B, D, L) -> (B, D, L)."""
    B, D, L = x.shape
    P = w1.shape[0]
    k = pool_kernel_size
    assert k % 2 == 1, "odd pool kernel required so the pooled length equals L"
    pad = (k - 1) // 2

    # Grid-invariant parameters: cast to f32 once here (not per grid step) and
    # pad d_prime up to a multiple of 8 sublanes (zero rows/cols are exact).
    P8 = ((P + 7) // 8) * 8
    w1f = w1.astype(jnp.float32)
    b1f = jnp.reshape(b1, (P, 1)).astype(jnp.float32)
    w2f = w2.astype(jnp.float32)
    b2f = jnp.reshape(b2, (D, 1)).astype(jnp.float32)
    if P8 != P:
        w1f = jnp.pad(w1f, ((0, P8 - P), (0, 0)))
        b1f = jnp.pad(b1f, ((0, P8 - P), (0, 0)))
        w2f = jnp.pad(w2f, ((0, 0), (0, P8 - P)))

    # Banded pooling matrix: column m averages taps |l - m| <= pad, scaled by
    # 1/k (AvgPool1d default count_include_pad=True; missing boundary taps
    # contribute 0 while the divisor stays k).  Built once; its block index is
    # constant so it stays resident across the grid.
    # TODO(synk): for very long L a dense band matmul is wasteful; a roll-based
    # pooling path would be preferable there.
    idx = jnp.arange(L, dtype=jnp.int32)
    band = jnp.abs(idx[:, None] - idx[None, :]) <= pad
    m = band.astype(jnp.float32) * (1.0 / k)                      # (L, L)

    bt = _choose_block_batch(B, D, L, jnp.dtype(x.dtype).itemsize,
                             target_tile_bytes=target_tile_bytes)
    num_tiles = B // bt

    # Rough VMEM budget: double-buffered in/out blocks + f32 intermediates.
    tile_f32_bytes = bt * D * max(L, 128) * 4
    vmem_limit = int(min(64 * 1024 * 1024,
                         max(32 * 1024 * 1024, 12 * tile_f32_bytes)))

    out = pl.pallas_call(
        _spatial_block_kernel,
        out_shape=jax.ShapeDtypeStruct((B, D, L), x.dtype),
        grid_spec=pl.GridSpec(
            grid=(num_tiles,),
            in_specs=[
                pl.BlockSpec((bt, D, L), lambda i: (i, 0, 0)),    # x batch-tile
                pl.BlockSpec((L, L), lambda i: (0, 0)),           # pooling band
                pl.BlockSpec((P8, D), lambda i: (0, 0)),          # fc1 weight
                pl.BlockSpec((P8, 1), lambda i: (0, 0)),          # fc1 bias
                pl.BlockSpec((D, P8), lambda i: (0, 0)),          # fc2 weight
                pl.BlockSpec((D, 1), lambda i: (0, 0)),           # fc2 bias
            ],
            out_specs=pl.BlockSpec((bt, D, L), lambda i: (i, 0, 0)),
        ),
        compiler_params=pltpu.CompilerParams(
            dimension_semantics=("parallel",),
            vmem_limit_bytes=vmem_limit,
        ),
    )(x, m, w1f, b1f, w2f, b2f)
    return out


def spatial_block_reference(x, w1, b1, w2, b2, *, pool_kernel_size):
    """Pure-JAX reference mirroring the PyTorch Spatial_Block.forward."""
    B, D, L = x.shape
    k = pool_kernel_size
    pad = (k - 1) // 2
    xp = jnp.pad(x, ((0, 0), (0, 0), (pad, pad)))
    pooled = sum(xp[:, :, j:j + L] for j in range(k)) / k            # (B, D, L)
    y = jnp.transpose(pooled, (0, 2, 1))                             # (B, L, D)
    h = jax.nn.relu(y @ w1.T + jnp.ravel(b1))                        # (B, L, P)
    s = jax.nn.sigmoid(h @ w2.T + jnp.ravel(b2))                     # (B, L, D)
    return x * jnp.transpose(s, (0, 2, 1))


if __name__ == "__main__":
    key = jax.random.PRNGKey(0)
    keys = jax.random.split(key, 10)

    # Config 1: B=8 (two (bt=4, D, L) grid steps), D=16, L=32, d_prime=8, k=3.
    B, D, L, d_prime, k = 8, 16, 32, 8, 3
    x = jax.random.normal(keys[0], (B, D, L), jnp.float32)
    bound1 = 1.0 / np.sqrt(D)
    w1 = jax.random.uniform(keys[1], (d_prime, D), jnp.float32, -bound1, bound1)
    b1 = jax.random.uniform(keys[2], (d_prime, 1), jnp.float32, -bound1, bound1)
    bound2 = 1.0 / np.sqrt(d_prime)
    w2 = jax.random.uniform(keys[3], (D, d_prime), jnp.float32, -bound2, bound2)
    b2 = jax.random.uniform(keys[4], (D, 1), jnp.float32, -bound2, bound2)

    out = jax.block_until_ready(spatial_block(x, w1, b1, w2, b2, pool_kernel_size=k))
    ref = spatial_block_reference(x, w1, b1, w2, b2, pool_kernel_size=k)
    np.testing.assert_allclose(np.asarray(out), np.asarray(ref), rtol=1e-4, atol=1e-4)

    # Config 2: B=6 (bt=3, two grid steps), d_prime=5 (exercises the pad-to-8
    # sublane path), pool kernel k=5.
    B2, d2, k2 = 6, 5, 5
    x2 = jax.random.normal(keys[5], (B2, D, L), jnp.float32)
    w1b_ = jax.random.uniform(keys[6], (d2, D), jnp.float32, -bound1, bound1)
    b1b_ = jax.random.uniform(keys[7], (d2, 1), jnp.float32, -bound1, bound1)
    bound2b = 1.0 / np.sqrt(d2)
    w2b_ = jax.random.uniform(keys[8], (D, d2), jnp.float32, -bound2b, bound2b)
    b2b_ = jax.random.uniform(keys[9], (D, 1), jnp.float32, -bound2b, bound2b)

    out2 = jax.block_until_ready(
        spatial_block(x2, w1b_, b1b_, w2b_, b2b_, pool_kernel_size=k2))
    ref2 = spatial_block_reference(x2, w1b_, b1b_, w2b_, b2b_, pool_kernel_size=k2)
    np.testing.assert_allclose(np.asarray(out2), np.asarray(ref2), rtol=1e-4, atol=1e-4)

    print("KERNEL_OK")
</pallas_src>

<mosaic_0001>
module attributes {stable_mosaic.version = 11 : i64} {
  func.func @_spatial_block_kernel(%arg0: i32, %arg1: memref<4x16x32xf32, #tpu.memory_space<vmem>>, %arg2: memref<32x32xf32, #tpu.memory_space<vmem>>, %arg3: memref<8x16xf32, #tpu.memory_space<vmem>>, %arg4: memref<8x1xf32, #tpu.memory_space<vmem>>, %arg5: memref<16x8xf32, #tpu.memory_space<vmem>>, %arg6: memref<16x1xf32, #tpu.memory_space<vmem>>, %arg7: memref<4x16x32xf32, #tpu.memory_space<vmem>>) attributes {dimension_semantics = [#tpu.dimension_semantics<parallel>], iteration_bounds = array<i64: 2>, scalar_prefetch = 0 : i64, scratch_operands = 0 : i64, tpu.core_type = #tpu.core_type<tc>, window_params = [{transform_indices = @transform_0, window_bounds = array<i64: 4, 16, 32>}, {pipeline_mode = #tpu.pipeline_mode<synchronous>, transform_indices = @transform_1, window_bounds = array<i64: 32, 32>}, {pipeline_mode = #tpu.pipeline_mode<synchronous>, transform_indices = @transform_2, window_bounds = array<i64: 8, 16>}, {pipeline_mode = #tpu.pipeline_mode<synchronous>, transform_indices = @transform_3, window_bounds = array<i64: 8, 1>}, {pipeline_mode = #tpu.pipeline_mode<synchronous>, transform_indices = @transform_4, window_bounds = array<i64: 16, 8>}, {pipeline_mode = #tpu.pipeline_mode<synchronous>, transform_indices = @transform_5, window_bounds = array<i64: 16, 1>}, {transform_indices = @transform_6, window_bounds = array<i64: 4, 16, 32>}]} {
    %c0 = arith.constant 0 : index
    %c0_0 = arith.constant 0 : index
    %c0_1 = arith.constant 0 : index
    %0 = vector.load %arg1[%c0, %c0_0, %c0_1] : memref<4x16x32xf32, #tpu.memory_space<vmem>>, vector<4x16x32xf32>
    %c0_2 = arith.constant 0 : index
    %c0_3 = arith.constant 0 : index
    %1 = vector.load %arg3[%c0_2, %c0_3] : memref<8x16xf32, #tpu.memory_space<vmem>>, vector<8x16xf32>
    %2 = vector.shape_cast %1 : vector<8x16xf32> to vector<1x8x16xf32>
    %3 = vector.broadcast %2 : vector<1x8x16xf32> to vector<4x8x16xf32>
    %cst = arith.constant dense<0.000000e+00> : vector<4x8x32xf32>
    %4 = tpu.matmul %3, %0, %cst {dimension_numbers = #tpu.dot_dimension_numbers<[2], [1], [1], [2], [0, 0, 0, 1, 1, 2], [0], [0]>} : vector<4x8x16xf32>, vector<4x16x32xf32>, vector<4x8x32xf32> -> vector<4x8x32xf32>
    %5 = vector.shape_cast %4 : vector<4x8x32xf32> to vector<32x32xf32>
    %c0_4 = arith.constant 0 : index
    %c0_5 = arith.constant 0 : index
    %6 = vector.load %arg2[%c0_4, %c0_5] : memref<32x32xf32, #tpu.memory_space<vmem>>, vector<32x32xf32>
    %cst_6 = arith.constant dense<0.000000e+00> : vector<32x32xf32>
    %7 = tpu.matmul %5, %6, %cst_6 {dimension_numbers = #tpu.dot_dimension_numbers<[1], [0], [0], [1], [0, 0, 1, 1], [], []>} : vector<32x32xf32>, vector<32x32xf32>, vector<32x32xf32> -> vector<32x32xf32>
    %8 = vector.shape_cast %7 : vector<32x32xf32> to vector<4x8x32xf32>
    %c0_7 = arith.constant 0 : index
    %c0_8 = arith.constant 0 : index
    %9 = vector.load %arg4[%c0_7, %c0_8] : memref<8x1xf32, #tpu.memory_space<vmem>>, vector<8x1xf32>
    %10 = vector.shape_cast %9 : vector<8x1xf32> to vector<1x8x1xf32>
    %11 = vector.broadcast %10 : vector<1x8x1xf32> to vector<4x8x32xf32>
    %12 = arith.addf %8, %11 : vector<4x8x32xf32>
    %cst_9 = arith.constant 0.000000e+00 : f32
    %13 = vector.broadcast %cst_9 : f32 to vector<4x8x32xf32>
    %14 = arith.maximumf %12, %13 : vector<4x8x32xf32>
    %c0_10 = arith.constant 0 : index
    %c0_11 = arith.constant 0 : index
    %15 = vector.load %arg5[%c0_10, %c0_11] : memref<16x8xf32, #tpu.memory_space<vmem>>, vector<16x8xf32>
    %16 = vector.shape_cast %15 : vector<16x8xf32> to vector<1x16x8xf32>
    %17 = vector.broadcast %16 : vector<1x16x8xf32> to vector<4x16x8xf32>
    %cst_12 = arith.constant dense<0.000000e+00> : vector<4x16x32xf32>
    %18 = tpu.matmul %17, %14, %cst_12 {dimension_numbers = #tpu.dot_dimension_numbers<[2], [1], [1], [2], [0, 0, 0, 1, 1, 2], [0], [0]>} : vector<4x16x8xf32>, vector<4x8x32xf32>, vector<4x16x32xf32> -> vector<4x16x32xf32>
    %c0_13 = arith.constant 0 : index
    %c0_14 = arith.constant 0 : index
    %19 = vector.load %arg6[%c0_13, %c0_14] : memref<16x1xf32, #tpu.memory_space<vmem>>, vector<16x1xf32>
    %20 = vector.shape_cast %19 : vector<16x1xf32> to vector<1x16x1xf32>
    %21 = vector.broadcast %20 : vector<1x16x1xf32> to vector<4x16x32xf32>
    %22 = arith.addf %18, %21 : vector<4x16x32xf32>
    %23 = arith.negf %22 : vector<4x16x32xf32>
    %24 = math.exp %23 : vector<4x16x32xf32>
    %cst_15 = arith.constant 1.000000e+00 : f32
    %25 = vector.broadcast %cst_15 : f32 to vector<4x16x32xf32>
    %26 = arith.addf %25, %24 : vector<4x16x32xf32>
    %27 = arith.divf %25, %26 : vector<4x16x32xf32>
    %28 = arith.mulf %0, %27 : vector<4x16x32xf32>
    %c0_16 = arith.constant 0 : index
    %c0_17 = arith.constant 0 : index
    %c0_18 = arith.constant 0 : index
    %29 = vector.load %arg7[%c0_16, %c0_17, %c0_18] : memref<4x16x32xf32, #tpu.memory_space<vmem>>, vector<4x16x32xf32>
    tpu.vector_store %arg7[%c0_16, %c0_17, %c0_18], %28 {strides = array<i32>} : memref<4x16x32xf32, #tpu.memory_space<vmem>>, vector<4x16x32xf32>,
    return
  }
  func.func @transform_0(%arg0: i32) -> (i32, i32, i32) {
    %c0_i32 = arith.constant 0 : i32
    %c0_i32_0 = arith.constant 0 : i32
    %c0_i32_1 = arith.constant 0 : i32
    return %arg0, %c0_i32, %c0_i32_0 : i32, i32, i32
  }
  func.func @transform_1(%arg0: i32) -> (i32, i32) {
    %c0_i32 = arith.constant 0 : i32
    %c0_i32_0 = arith.constant 0 : i32
    %c0_i32_1 = arith.constant 0 : i32
    return %c0_i32, %c0_i32_0 : i32, i32
  }
  func.func @transform_2(%arg0: i32) -> (i32, i32) {
    %c0_i32 = arith.constant 0 : i32
    %c0_i32_0 = arith.constant 0 : i32
    %c0_i32_1 = arith.constant 0 : i32
    return %c0_i32, %c0_i32_0 : i32, i32
  }
  func.func @transform_3(%arg0: i32) -> (i32, i32) {
    %c0_i32 = arith.constant 0 : i32
    %c0_i32_0 = arith.constant 0 : i32
    %c0_i32_1 = arith.constant 0 : i32
    return %c0_i32, %c0_i32_0 : i32, i32
  }
  func.func @transform_4(%arg0: i32) -> (i32, i32) {
    %c0_i32 = arith.constant 0 : i32
    %c0_i32_0 = arith.constant 0 : i32
    %c0_i32_1 = arith.constant 0 : i32
    return %c0_i32, %c0_i32_0 : i32, i32
  }
  func.func @transform_5(%arg0: i32) -> (i32, i32) {
    %c0_i32 = arith.constant 0 : i32
    %c0_i32_0 = arith.constant 0 : i32
    %c0_i32_1 = arith.constant 0 : i32
    return %c0_i32, %c0_i32_0 : i32, i32
  }
  func.func @transform_6(%arg0: i32) -> (i32, i32, i32) {
    %c0_i32 = arith.constant 0 : i32
    %c0_i32_0 = arith.constant 0 : i32
    %c0_i32_1 = arith.constant 0 : i32
    return %arg0, %c0_i32, %c0_i32_0 : i32, i32, i32
  }
}

</mosaic_0001>

<bundles_post_ra>
// kernel: spatial_block.1
= control target key start
LH: loop header
LB: loop body
LE: loop exit
PB: predicated region body
PF: predicated region fallthrough
CT: control target
= control target key end

     0   :  { %11 = vsyncpa [#allocation3], 0  ;;  %s1766_s0 = inlined_call_operand.hbm [shape: f32[8,16,32], index: 0, kind: input, shape index: {}]   ;;  %s1767_s1 = inlined_call_operand.vmem [shape: f32[32,32], index: 1, kind: input, shape index: {}]   ;;  %s1768_s2 = inlined_call_operand.vmem [shape: f32[8,16], index: 2, kind: input, shape index: {}]   ;;  %s1769_s3 = inlined_call_operand.vmem [shape: f32[8,1], index: 3, kind: input, shape index: {}]   ;;  %s1770_s4 = inlined_call_operand.vmem [shape: f32[16,8], index: 4, kind: input, shape index: {}]   ;;  %s1771_s5 = inlined_call_operand.vmem [shape: f32[16,1], index: 5, kind: input, shape index: {}]   ;;  %s1772_s6 = inlined_call_operand.hbm [shape: f32[8,16,32], index: 6, kind: output, shape index: {}]  }
   0x1   :  { %13 = vsyncpa [#allocation3 + $0x1], 0 }
   0x2   :  { %14 = vsyncpa [#allocation4], 0 }
   0x3   :  { %16 = vsyncpa [#allocation4 + $0x1], 0  ;;  %s1518_s21 = smov 0   ;;  %s1520_s22 = smov 0  }
   0x4   :  { %s1522_s23 = smov 0   ;;  %s1524_s24 = smov 0  }
   0x5 LB: > { %s1539_s25 = sadd.s32 4294967295, %s1472_s24   ;;  %s1155_s26 = sadd.s32 4294967294, %s1472_s24   ;;  %s1472_s24 = sphi %s1524_s24, %s1787_s24   ;;  %s1468_s23 = sphi %s1522_s23, %s1786_s23   ;;  %s1464_s22 = sphi %s1520_s22, %s1785_s22   ;;  %s1460_s21 = sphi %s1518_s21, %s1784_s21  }
   0x6   : > { %s1543_s27 = sadd.s32 1, %s1472_s24   ;;  %s29_s28 = sadd.s32 1, %s1468_s23 }
   0x7   : > { %s26_s29 = ssub.s32 %s1472_s24, %s1543_s27  ;;  %p36_p0 = scmp.ne.s32.totalorder %s1468_s23, %s1464_s22 }
   0x8   : > { %p27_p1 = scmp.eq.s32.totalorder %s26_s29, 0  ;;  %p37_p2 = scmp.eq.s32.totalorder %s1472_s24, 0 }
   0x9   : > { %p42_p3 = scmp.ne.s32.totalorder %s1464_s22, %s1460_s21  ;;  %p43_p4 = scmp.eq.s32.totalorder %s1539_s25, 0 }
   0xa   : > { %s1555_s30 = scalar_select %p27_p1, %s1468_s23, %s29_s28  }
   0xb   : > { %p1557_p5 = por %p37_p2, %p36_p0  ;;  %p1561_p6 = por %p43_p4, %p42_p3 }
   0xc   : > { %p171_p7 = scmp.eq.s32.totalorder %s1539_s25, 1  ;;  %p177_p8 = scmp.eq.s32.totalorder %s1155_s26, 1 }
   0xd   : > { %s1776_s8 = scalar_select %p1561_p6, 1, 0 }
   0xe   : > { %p1305_p10 = scmp.lt.s32.totalorder %s1472_s24, 2  ;;  %p1568_p11 = por %p171_p7, %p36_p0 }
   0xf   : > { %p1572_p12 = por %p177_p8, %p42_p3  ;;  %s212_s11 = sand.u32 1, %s1468_s23  }
  0x10   : > { %s1777_s9 = scalar_select %p1568_p11, 1, 0 }
  0x11   : > { %s1778_s10 = scalar_select %p1572_p12, 1, 0 }
  0x12   : > { %s1196_s12 = sshll.u32 %s1472_s24, 10  ;;  %s1158_s13 = sshll.u32 %s212_s11, 6 }
  0x13   : > { %s1581_s16 = scalar_lea.hbm %s1766_s0, %s1196_s12  ;;  %s216_s17 = scalar_lea.vmem [#allocation2], %s1158_s13 }
  0x14   : > { %s224_s18 = sshll.u32 %s216_s17, 4  ;;  %p1585_p13 = pnand %p1305_p10, %p1557_p5  ;;  %s1589_s18 = int_to_ptr.vmem [resolvable:$true] %s224_s18 }
  0x15   : > { %s1591_s20 = scalar_lea.sflag [#allocation3], %s212_s11  ;;  %s1380_s26 = scalar_lea.hbm %s1581_s16, 1024 }
  0x16   : > { %p1381_p0 = scmp.ne.s32.totalorder %s1581_s16, %s1380_s26  ;;  %p1382_p1 = pneg %p1585_p13 }
  0x17   : > { %s1385_s12 = scalar_lea.hbm %s1766_s0, 2048  ;;  %p1386_p4 = scmp.lt.s32.totalorder %s1581_s16, %s1766_s0 }
  0x18   : > { %p1383_p2 = pnand %p1382_p1, %p1381_p0  ;;  %p1387_p5 = scmp.lt.s32.totalorder %s1385_s12, %s1380_s26 }
  0x1a   : > { %p1384_p3 = pneg %p1383_p2  ;;  %p1388_p7 = por %p1387_p5, %p1386_p4 }
  0x1c   : > { %p1389_p8 = pnand %p1388_p7, %p1384_p3 }
  0x1e   : > { %1392 = shalt.err (!%p1389_p8)
}
  0x1f   : > { %s1393_s11 = scalar_lea.vmem %s1589_s18, 1024  ;;  %s1474_s14 = smov [#allocation2]  }
  0x20   : > { %p1394_p10 = scmp.ne.s32.totalorder %s1589_s18, %s1393_s11  ;;  %s1398_s15 = sshll.u32 %s1474_s14, 4  ;;  %s1399_s15 = int_to_ptr.vmem [resolvable:$false] %s1398_s15 }
  0x21   : > { %s1400_s17 = scalar_lea.vmem %s1399_s15, 2048  ;;  %p1401_p2 = scmp.lt.s32.totalorder %s1589_s18, %s1399_s15 }
  0x22   : > { %p1396_p9 = pnand %p1394_p10, %p1382_p1  ;;  %p1402_p12 = scmp.lt.s32.totalorder %s1400_s17, %s1393_s11 }
  0x24   : > { %p1397_p0 = pneg %p1396_p9  ;;  %p1403_p11 = por %p1402_p12, %p1401_p2 }
  0x26   : > { %p1404_p6 = pnand %p1403_p11, %p1397_p0 }
  0x28   : > { %1407 = shalt.err (!%p1404_p6)
}
  0x29   : > { %s1475_s26 = smov 128   ;;  %s1476_s28 = smov 8  }
  0x2a   : > { %1300 = dma.hbm_to_vmem [thread:$0]  (!%p1585_p13), %s1581_s16, 1024, %s1589_s18, %s1591_s20, %s1475_s26, %s1475_s26, %s1476_s28  }
  0x2b   : > { %p1162_p9 = scmp.ge.s32.totalorder %s1472_s24, 1  ;;  %p232_p1 = scmp.lt.s32.totalorder %s1472_s24, 3 }
  0x2d   : > { %p233_p3 = pnand %p1162_p9, %p232_p1 }
  0x2e   : > { %s1615_s29 = sand.u32 (!%p233_p3), 1, %s1464_s22   ;;  %p1780_p6 = scmp.ne.s32.totalorder (!%p233_p3), %s1776_s8, 0 }
  0x2f   : > { %236 = sbr.rel (%p233_p3) target bundleno = 708 (0x2c4), region = 44  ;;  %s1163_s12 = sshll.u32 (!%p233_p3), %s1615_s29, 6 }
  0x30   : > { %s239_s7 = scalar_lea.sflag (!%p233_p3), [#allocation3], %s1615_s29  ;;  %s242_s13 = scalar_lea.vmem (!%p233_p3), [#allocation2], %s1163_s12 }
  0x34   : > { %1451 = dma.done.wait (%p1780_p6), %s239_s7, 1024  }
  0x35   : > { %1453 = vsyncadd (%p1780_p6), %s239_s7, 4294966272  ;;  %v1477_v0 = vmov 0.0   ;;  %vm1478_vm0 = vmmov 0   ;;  %v1627_v1 = vld [vmem:[%s242_s13 + $0x8] sm:$0xff]  ;;  %v1629_v2 = vld [vmem:[%s242_s13 + $0x18] sm:$0xff]  ;;  %vm282_vm1 = vcmask 130048  }
  0x36   : > { %1231 = vmatprep.subr.mxu0 %v1477_v0  ;;  %1238 = vmatprep.subr.mxu1 %v1477_v0  ;;  %v1631_v3 = vld [vmem:[%s242_s13] sm:$0xff]  ;;  %v1635_v4 = vld [vmem:[%s242_s13 + $0x10] sm:$0xff]  ;;  %v1642_v6 = vld [vmem:[%s242_s13 + $0x28] sm:$0xff]  ;;  %v1479_v15 = vmov 0   ;;  %vm570_vm2 = vcmask 261120   ;;  %vm696_vm3 = vcmask 64512  }
  0x37   : > { %1235 = vmatprep.mubr.msk.f32.mxu0 %vm1478_vm0, %v1477_v0  ;;  %1242 = vmatprep.mubr.msk.f32.mxu1 %vm1478_vm0, %v1477_v0  ;;  %v281_v5 = vld [vmem:[%s1768_s2] sm:$0xff]  ;;  %v1644_v7 = vld [vmem:[%s242_s13 + $0x38] sm:$0xff]  ;;  %v1652_v9 = vld [vmem:[%s242_s13 + $0x30] sm:$0xff]  ;;  %s270_s15 = scalar_lea.vmem [#allocation5], %s1163_s12  ;;  %s1198_s12 = sshll.u32 %s1539_s25, 10 }
  0x38   : > { %1232 = vmatpush3.msra.mxu0 %v1627_v1  ;;  %1239 = vmatpush3.msra.mxu1 %v1629_v2  ;;  %v1648_v8 = vld [vmem:[%s242_s13 + $0x20] sm:$0xff]  ;;  %v569_v10 = vld [vmem:[%s1767_s1 + $0x18] sm:$0xff]  ;;  %v568_v11 = vld [vmem:[%s1767_s1 + $0x10] sm:$0xff]  ;;  %s1082_s17 = sshll.u32 %s270_s15, 4  ;;  %s1718_s7 = scalar_lea.hbm %s1772_s6, %s1198_s12  ;;  %s1720_s17 = int_to_ptr.vmem [resolvable:$true] %s1082_s17 }
  0x39   : > { %1233 = vmatprep.subr.mxu0 %v1477_v0  ;;  %1240 = vmatprep.subr.mxu1 %v1477_v0  ;;  %v567_v12 = vld [vmem:[%s1767_s1 + $0x8] sm:$0xff]  ;;  %v566_v13 = vld [vmem:[%s1767_s1] sm:$0xff]  ;;  %s1068_s25 = scalar_lea.sflag [#allocation4], %s1615_s29  ;;  %s1408_s13 = scalar_lea.vmem %s1720_s17, 1024 }
  0x3a   : > { %1234 = vmatpush3.msra.mxu0 %v1631_v3  ;;  %1241 = vmatpush3.msra.mxu1 %v1635_v4  ;;  %v668_v14 = vld [vmem:[%s1769_s3] sm:$0xff]  ;;  %v685_v26 = vld [vmem:[%s1771_s5 + $0x8] sm:$0xff]  ;;  %p1409_p11 = scmp.ne.s32.totalorder %s1720_s17, %s1408_s13  ;;  %p1781_p12 = scmp.ne.s32.totalorder %s1777_s9, 0 }
  0x3b   : > { %1236 = vmatmul.mubr.msk.f32.vlgmr.msra.gmra.mxu0 %vm282_vm1, %v281_v5  ;;  %1243 = vmatmul.mubr.msk.f32.vlgmr.msra.gmra.mxu1 %vm282_vm1, %v281_v5  ;;  %v684_v16 = vld [vmem:[%s1771_s5] sm:$0xff]  ;;  %v683_v34 = vld [vmem:[%s1770_s4 + $0x8] sm:$0xff]  ;;  %s1480_s8 = smov [#allocation5]  }
  0x3c   : > { %1245 = vmatprep.subr.mxu0 %v1477_v0  ;;  %1252 = vmatprep.subr.mxu1 %v1477_v0  ;;  %v682_v25 = vld [vmem:[%s1770_s4] sm:$0xff]  ;;  %p1410_p13 = pnand %p1409_p11, %p1781_p12  ;;  %s1412_s16 = sshll.u32 %s1480_s8, 4  ;;  %s1413_s16 = int_to_ptr.vmem [resolvable:$false] %s1412_s16 }
  0x3d   : > { %1246 = vmatpush3.msra.mxu0 %v1642_v6  ;;  %1253 = vmatpush3.msra.mxu1 %v1644_v7  ;;  %s1414_s18 = scalar_lea.vmem %s1413_s16, 2048  ;;  %p1415_p5 = scmp.lt.s32.totalorder %s1720_s17, %s1413_s16 }
  0x3e   : > { %1247 = vmatprep.subr.mxu0 %v1477_v0  ;;  %1249 = vmatprep.mubr.msk.f32.mxu0 %vm1478_vm0, %v1477_v0  ;;  %p1411_p4 = pneg %p1410_p13  ;;  %p1416_p7 = scmp.lt.s32.totalorder %s1414_s18, %s1408_s13 }
  0x3f   : > { %1248 = vmatpush3.msra.mxu0 %v1648_v8  ;;  %1254 = vmatprep.subr.mxu1 %v1477_v0 }
  0x40   : > { %1250 = vmatmul.mubr.msk.f32.vlgmr.msra.gmra.mxu0 %vm282_vm1, %v281_v5  ;;  %1255 = vmatpush3.msra.mxu1 %v1652_v9  ;;  %p1417_p8 = por %p1416_p7, %p1415_p5 }
  0x41   : > { %1256 = vmatprep.mubr.msk.f32.mxu1 %vm1478_vm0, %v1477_v0  ;;  %1259 = vmatprep.subr.mxu0 %v569_v10 }
  0x42   : > { %1257 = vmatmul.mubr.msk.f32.vlgmr.msra.gmra.mxu1 %vm282_vm1, %v281_v5  ;;  %1260 = vmatpush3.msra.mxu0 %v569_v10  ;;  %p1418_p10 = pnand %p1417_p8, %p1411_p4 }
  0x43   : > { %1261 = vmatprep.subr.mxu0 %v568_v11  ;;  %1346 = vset.pattern.permute.xlu0 %v1479_v15 }
  0x44   : > { %1262 = vmatpush3.msra.mxu0 %v568_v11  ;;  %1347 = vset.pattern.permute.xlu1 %v1479_v15 }
  0x45   : > { %1263 = vmatprep.subr.mxu0 %v567_v12  ;;  %671 = vperm.xlu0 %1346, %v668_v14  }
  0x46   : > { %1264 = vmatpush3.msra.mxu0 %v567_v12  ;;  %1275 = vmatprep.mubr.msk.f32.mxu1 %vm696_vm3, %v682_v25 }
  0x47   : > { %1265 = vmatprep.subr.mxu0 %v566_v13  ;;  %693 = vperm.xlu1 %1347, %v685_v26  }
  0x48   : > { %1266 = vmatpush3.msra.mxu0 %v566_v13 }
  0x49   : > { %688 = vperm.xlu0 %1346, %v684_v16  }
  0xc0   : > { %v672_v28 = vpop.permute.xlu0 %671 }
  0xc2   : > { %v694_v41 = vpop.permute.xlu1 %693 }
  0xc4   : > { %v689_v44 = vpop.permute.xlu0 %688 }
  0xfb   : > { %v352_v17 = vpop.f32.mrf.mxu0  ;;  %v422_v18 = vpop.f32.mrf.mxu1 }
  0xfc   : > { %1267 = vmatprep.mubr.msk.f32.mxu0 %vm570_vm2, %v352_v17 }
  0xfd   : > { %v1237_v19 = vpop.f32.mrf.mxu0  ;;  %v1244_v20 = vpop.f32.mrf.mxu1  ;;  %1268 = vmatmul.mubr.msk.f32.vlgmr.msra.gmra.mxu0 %vm570_vm2, %v422_v18 }
 0x100   : > { %v492_v21 = vpop.f32.mrf.mxu0 }
 0x101   : > { %1270 = vmatprep.mubr.msk.f32.mxu0 %vm570_vm2, %v492_v21 }
 0x102   : > { %v562_v22 = vpop.f32.mrf.mxu1  ;;  %v1251_v23 = vpop.f32.mrf.mxu0 }
 0x103   : > { %1271 = vmatmul.mubr.msk.f32.gmra.mxu0 %vm570_vm2, %v562_v22 }
 0x104   : > { %v1258_v24 = vpop.f32.mrf.mxu1  ;;  %1290 = vmatprep.mubr.msk.f32.mxu0 %vm696_vm3, %v682_v25 }
 0x1bd   : > { %v1269_v27 = vpop.f32.mrf.mxu0 }
 0x1be   : > { %v675_v30 = vadd.f32 %v1269_v27, %v672_v28 }
 0x1bf   : > { %v649_v29 = vpop.f32.mrf.mxu0 }
 0x1c0   : > { %v674_v31 = vadd.f32 %v672_v28, %v649_v29  ;;  %v679_v35 = vmax.f32 %v675_v30, 0.0 }
 0x1c2   : > { %v678_v32 = vmax.f32 %v674_v31, 0.0 }
 0x1c3   : > { %v1272_v33 = vpop.f32.mrf.mxu0 }
 0x1c4   : > { %v677_v36 = vadd.f32 %v1272_v33, %v672_v28  ;;  %1273 = vmatprep.subr.mxu1 %v678_v32 }
 0x1c5   : > { %v659_v37 = vpop.f32.mrf.mxu0  ;;  %1274 = vmatpush3.msra.mxu1 %v678_v32 }
 0x1c6   : > { %v681_v38 = vmax.f32 %v677_v36, 0.0  ;;  %v676_v39 = vadd.f32 %v672_v28, %v659_v37  ;;  %1276 = vmatmul.mubr.msk.f32.vlgmr.msra.gmra.mxu1 %vm696_vm3, %v683_v34  ;;  %1278 = vmatprep.subr.mxu1 %v679_v35 }
 0x1c7   : > { %1279 = vmatpush3.msra.mxu1 %v679_v35  ;;  %1280 = vmatprep.mubr.msk.f32.mxu1 %vm696_vm3, %v682_v25 }
 0x1c8   : > { %v680_v40 = vmax.f32 %v676_v39, 0.0  ;;  %1288 = vmatprep.subr.mxu0 %v681_v38 }
 0x1c9   : > { %1289 = vmatpush3.msra.mxu0 %v681_v38 }
 0x1ca   : > { %1283 = vmatprep.subr.mxu1 %v680_v40  ;;  %1291 = vmatmul.mubr.msk.f32.vlgmr.msra.gmra.mxu0 %vm696_vm3, %v683_v34 }
 0x1cb   : > { %1281 = vmatmul.mubr.msk.f32.vlgmr.msra.gmra.mxu1 %vm696_vm3, %v683_v34 }
 0x1cc   : > { %1284 = vmatpush3.msra.mxu1 %v680_v40  ;;  %1285 = vmatprep.mubr.msk.f32.mxu1 %vm696_vm3, %v682_v25 }
 0x1cf   : > { %1286 = vmatmul.mubr.msk.f32.vlgmr.msra.gmra.mxu1 %vm696_vm3, %v683_v34 }
 0x286   : > { %v1277_v42 = vpop.f32.mrf.mxu1 }
 0x287   : > { %v775_v43 = vadd.f32 %v1277_v42, %v694_v41 }
 0x288   : > { %v769_v45 = vpop.f32.mrf.mxu1 }
 0x289   : > { %v770_v46 = vadd.f32 %v769_v45, %v689_v44  ;;  %v1182_v47 = vmul.f32 -1.442695, %v775_v43 }
 0x28a   : > { %v1292_v48 = vpop.f32.mrf.mxu0 }
 0x28b   : > { %v1181_v49 = vmul.f32 -1.442695, %v770_v46  ;;  %v1000_v50 = vadd.f32 %v1292_v48, %v694_v41  ;;  %1348 = vpow2.f32 %v1182_v47  ;;  %v1282_v51 = vpop.f32.mrf.mxu1 }
 0x28c   : > { %v850_v52 = vadd.f32 %v1282_v51, %v694_v41  ;;  %v994_v53 = vpop.f32.mrf.mxu0 }
 0x28d   : > { %1350 = vpow2.f32 %v1181_v49  ;;  %v1188_v54 = vmul.f32 -1.442695, %v1000_v50  ;;  %v995_v55 = vadd.f32 %v994_v53, %v689_v44  ;;  %v844_v56 = vpop.f32.mrf.mxu1 }
 0x28e   : > { %v1184_v57 = vmul.f32 -1.442695, %v850_v52  ;;  %v845_v58 = vadd.f32 %v844_v56, %v689_v44 }
 0x28f   : > { %1352 = vpow2.f32 %v1188_v54  ;;  %v1187_v59 = vmul.f32 -1.442695, %v995_v55  ;;  %v1287_v60 = vpop.f32.mrf.mxu1 }
 0x290   : > { %1354 = vpow2.f32 %v1184_v57  ;;  %v1183_v61 = vmul.f32 -1.442695, %v845_v58  ;;  %v925_v62 = vadd.f32 %v1287_v60, %v694_v41 }
 0x291   : > { %1356 = vpow2.f32 %v1187_v59  ;;  %v919_v63 = vpop.f32.mrf.mxu1 }
 0x292   : > { %1358 = vpow2.f32 %v1183_v61  ;;  %v1186_v0 = vmul.f32 -1.442695, %v925_v62  ;;  %v920_v5 = vadd.f32 %v919_v63, %v689_v44 }
 0x294   : > { %1360 = vpow2.f32 %v1186_v0  ;;  %v1185_v10 = vmul.f32 -1.442695, %v920_v5 }
 0x296   : > { %1362 = vpow2.f32 %v1185_v10 }
 0x298   : > { %v1349_v11 = vpop.eup %1348 }
 0x299   : > { %v1028_v12 = vadd.f32 1.0, %v1349_v11 }
 0x29a   : > { %v1351_v13 = vpop.eup %1350 }
 0x29b   : > { %v1027_v14 = vadd.f32 1.0, %v1351_v13  ;;  %1364 = vrcp.f32 %v1028_v12 }
 0x29c   : > { %v1353_v15 = vpop.eup %1352 }
 0x29d   : > { %v1355_v16 = vpop.eup %1354  ;;  %1366 = vrcp.f32 %v1027_v14  ;;  %v1034_v17 = vadd.f32 1.0, %v1353_v15 }
 0x29e   : > { %v1357_v18 = vpop.eup %1356  ;;  %v1030_v19 = vadd.f32 1.0, %v1355_v16 }
 0x29f   : > { %v1359_v20 = vpop.eup %1358  ;;  %1368 = vrcp.f32 %v1034_v17  ;;  %v1033_v21 = vadd.f32 1.0, %v1357_v18 }
 0x2a0   : > { %1370 = vrcp.f32 %v1030_v19  ;;  %v1029_v22 = vadd.f32 1.0, %v1359_v20 }
 0x2a1   : > { %v1361_v23 = vpop.eup %1360  ;;  %1372 = vrcp.f32 %v1033_v21 }
 0x2a2   : > { %1374 = vrcp.f32 %v1029_v22  ;;  %v1032_v24 = vadd.f32 1.0, %v1361_v23 }
 0x2a3   : > { %v1363_v25 = vpop.eup %1362 }
 0x2a4   : > { %1376 = vrcp.f32 %v1032_v24  ;;  %v1031_v26 = vadd.f32 1.0, %v1363_v25 }
 0x2a6   : > { %1378 = vrcp.f32 %v1031_v26 }
 0x2a8   : > { %v1365_v27 = vpop.eup %1364 }
 0x2a9   : > { %v1052_v28 = vmul.f32 %v1365_v27, %v1627_v1 }
 0x2aa   : > { %v1367_v29 = vpop.eup %1366 }
 0x2ab   : > { %v1051_v30 = vmul.f32 %v1367_v29, %v1631_v3  ;;  %1060 = vst.msk [vmem:[%s270_s15 + $0x8] sm:$0xff] %vm570_vm2, %v1052_v28 }
 0x2ac   : > { %v1369_v31 = vpop.eup %1368 }
 0x2ad   : > { %v1371_v32 = vpop.eup %1370  ;;  %1059 = vst.msk [vmem:[%s270_s15] sm:$0xff] %vm570_vm2, %v1051_v30  ;;  %v1058_v33 = vmul.f32 %v1369_v31, %v1644_v7 }
 0x2ae   : > { %v1373_v34 = vpop.eup %1372  ;;  %v1054_v35 = vmul.f32 %v1371_v32, %v1629_v2 }
 0x2af   : > { %v1375_v36 = vpop.eup %1374  ;;  %1066 = vst.msk [vmem:[%s270_s15 + $0x38] sm:$0xff] %vm570_vm2, %v1058_v33  ;;  %v1057_v1 = vmul.f32 %v1373_v34, %v1652_v9 }
 0x2b0   : > { %1062 = vst.msk [vmem:[%s270_s15 + $0x18] sm:$0xff] %vm570_vm2, %v1054_v35  ;;  %v1053_v3 = vmul.f32 %v1375_v36, %v1635_v4 }
 0x2b1   : > { %v1377_v37 = vpop.eup %1376  ;;  %1065 = vst.msk [vmem:[%s270_s15 + $0x30] sm:$0xff] %vm570_vm2, %v1057_v1 }
 0x2b2   : > { %1061 = vst.msk [vmem:[%s270_s15 + $0x10] sm:$0xff] %vm570_vm2, %v1053_v3  ;;  %v1056_v2 = vmul.f32 %v1377_v37, %v1642_v6 }
 0x2b3   : > { %v1379_v7 = vpop.eup %1378 }
 0x2b4   : > { %1064 = vst.msk [vmem:[%s270_s15 + $0x28] sm:$0xff] %vm570_vm2, %v1056_v2  ;;  %v1055_v4 = vmul.f32 %v1379_v7, %v1648_v8 }
 0x2b6   : > { %1063 = vst.msk [vmem:[%s270_s15 + $0x20] sm:$0xff] %vm570_vm2, %v1055_v4 }
 0x2b7   : > { %1421 = shalt.err (!%p1418_p10)
}
 0x2b8   : > { %s1422_s19 = scalar_lea.hbm %s1718_s7, 1024  ;;  %s1426_s14 = scalar_lea.hbm %s1772_s6, 2048 }
 0x2b9   : > { %p1423_p0 = scmp.ne.s32.totalorder %s1718_s7, %s1422_s19  ;;  %p1427_p1 = scmp.lt.s32.totalorder %s1718_s7, %s1772_s6 }
 0x2ba   : > { %p1428_p3 = scmp.lt.s32.totalorder %s1426_s14, %s1422_s19 }
 0x2bb   : > { %p1424_p2 = pnand %p1423_p0, %p1781_p12 }
 0x2bc   : > { %p1429_p6 = por %p1428_p3, %p1427_p1 }
 0x2bd   : > { %p1425_p9 = pneg %p1424_p2 }
 0x2bf   : > { %p1430_p11 = pnand %p1429_p6, %p1425_p9 }
 0x2c1   : > { %1433 = shalt.err (!%p1430_p11)
}
 0x2c2   : > { %s1481_s26 = smov 128   ;;  %s1482_s28 = smov 8  }
 0x2c3   : > { %1295 = dma.vmem_to_hbm [thread:$0]  (%p1781_p12), %s1720_s17, 1024, %s1718_s7, %s1068_s25, %s1481_s26, %s1481_s26, %s1482_s28  }
 0x2c4 PF: > { %s1097_s13 = sand.u32 1, %s1460_s21   ;;  %p1782_p13 = scmp.ne.s32.totalorder %s1778_s10, 0 }
 0x2c5   : > { %p1783_p4 = scmp.ge.s32.totalorder %s1472_s24, 2  ;;  %s1098_s8 = scalar_lea.sflag [#allocation4], %s1097_s13 }
 0x2c7   : > { %p1302_p5 = pnand %p1783_p4, %p1782_p13 }
 0x2c9   : > { %p1303_p7 = pneg %p1302_p5 }
 0x2cb   : > { %1455 = dma.done.wait (%p1303_p7), %s1098_s8, 1024  }
 0x2cc   : > { %1457 = vsyncadd (%p1303_p7), %s1098_s8, 4294966272  ;;  %p19_p8 = scmp.ge.s32.totalorder %s1543_s27, 4   ;;  %s1784_s21 = smov %s1464_s22 }
 0x2cd   : > { %s1785_s22 = smov %s1468_s23  ;;  %s1786_s23 = smov %s1555_s30 }
 0x2ce   : > { %s1787_s24 = smov %s1543_s27  ;;  %21 = sbr.rel (!%p19_p8) target bundleno = 5 (0x5), region = 89 }
 0x2d3   :  { %1103 = vsyncpa [#allocation3], 1 }
 0x2d4   :  { %1105 = vsyncpa [#allocation3 + $0x1], 1 }
 0x2d5   :  { %1106 = vsyncpa [#allocation4], 1 }
 0x2d6   :  { %1108 = vsyncpa [#allocation4 + $0x1], 1 }

</bundles_post_ra>
